<compile_context>
chip_gen: v7x
topology: tpu7x:2x2x1
jax: 0.10.0
libtpu: 0.0.40
codegen_flags: <defaults>
</compile_context>

<pallas_src>
import functools

import jax
import jax.numpy as jnp
from jax.experimental import pallas as pl
from jax.experimental.pallas import tpu as pltpu

LANE = 128
ROW_ALIGN = 32            # int8 tiling wants second-minor multiples of 32
MAX_ROW_TILE = 4096       # ~6 MiB double-buffered VMEM for the 3-stream path
MAX_ROW_TILE_AOLP = 1024  # ~6 MiB for the (optional, zero-weight) 7-stream path


def _default_num_slices():
    """2 slices only on multi-TensorCore chips (v7x); 1 on v5e/v6e."""
    # TODO(synk): on v7x, CORE_PARALLEL / core_map may be needed for the
    # leading axis to actually shard across both TensorCores.
    try:
        kind = jax.devices()[0].device_kind.lower()
    except Exception:
        return 1
    return 2 if "v7" in kind else 1


def _pir_kernel(alpha, n_elems, include_aolp, *refs):
    """One grid step: stream a (row_tile, 128) slab of rays and accumulate the
    per-term partial sums into (8, 128) VMEM accumulators."""
    if include_aolp:
        (sdf_ref, net_ref, obj_ref, aolp_p_ref, aolp_g_ref, refl_ref,
         trans_ref, out_ref, bce_acc, cnt_acc, aolp_acc, sel_acc) = refs
    else:
        (sdf_ref, net_ref, obj_ref, out_ref, bce_acc, cnt_acc) = refs
        aolp_acc = sel_acc = None

    c = pl.program_id(0)
    i = pl.program_id(1)
    steps = pl.num_programs(1)

    @pl.when(i == 0)
    def _init():
        bce_acc[...] = jnp.zeros_like(bce_acc)
        cnt_acc[...] = jnp.zeros_like(cnt_acc)
        if include_aolp:
            aolp_acc[...] = jnp.zeros_like(aolp_acc)
            sel_acc[...] = jnp.zeros_like(sel_acc)

    rt = sdf_ref.shape[0]

    # Global element index of every lane in this tile.  Lanes >= n_elems
    # (ragged tail, OOB padding of a partial block, clamped duplicate blocks)
    # contribute exactly zero.  int32 index is fine for n < 2^31 elements.
    blk = c * steps + i                                    # un-clamped block id
    row = jax.lax.broadcasted_iota(jnp.int32, (rt, LANE), 0)
    lane = jax.lax.broadcasted_iota(jnp.int32, (rt, LANE), 1)
    gidx = (blk * rt + row) * LANE + lane
    in_range = gidx < n_elems

    sdf = sdf_ref[...]
    net = net_ref[...].astype(jnp.float32)
    obj = obj_ref[...].astype(jnp.float32)

    # ---- mask loss: BCE-with-logits summed over ~(net & obj) ----
    not_both = 1.0 - net * obj                             # ~(net & obj) as 0/1
    x = -alpha * sdf                                       # sdf_pred
    bce = jnp.maximum(x, 0.0) - x * obj + jnp.log1p(jnp.exp(-jnp.abs(x)))
    # `where` (not multiply) so NaN/Inf from undefined OOB lanes cannot leak in.
    bce_c = jnp.where(in_range, bce * not_both, 0.0)
    cnt_c = jnp.where(in_range, not_both, 0.0)

    # Tile -> (8, 128) partial reduction: pure vreg-to-vreg VPU adds hidden
    # under the DMA.  (f32 sums stay exact for counts up to ~2^24.)
    bce_acc[...] += bce_c.reshape(rt // 8, 8, LANE).sum(axis=0)
    cnt_acc[...] += cnt_c.reshape(rt // 8, 8, LANE).sum(axis=0)

    if include_aolp:
        aolp_p = aolp_p_ref[...]
        aolp_g = aolp_g_ref[...]
        refl = refl_ref[...]
        trans = trans_ref[...]
        # percentage = refl / (refl + trans), nan -> 0, clamp to [0, 1]
        ratio = refl / (refl + trans)                      # exact divide
        pct = jnp.clip(jnp.where(jnp.isnan(ratio), 0.0, ratio), 0.0, 1.0)
        valid = (aolp_g > 0.0).astype(jnp.float32)
        sel = net * obj * valid                            # net & obj & valid
        l1 = jnp.abs(aolp_p - aolp_g)
        keep = (l1 <= (jnp.pi / 6.0)).astype(jnp.float32)  # drop loss > pi/6
        aolp_c = jnp.where(in_range, sel * keep * l1 * pct, 0.0)
        sel_c = jnp.where(in_range, sel, 0.0)
        aolp_acc[...] += aolp_c.reshape(rt // 8, 8, LANE).sum(axis=0)
        sel_acc[...] += sel_c.reshape(rt // 8, 8, LANE).sum(axis=0)

    @pl.when(i == steps - 1)
    def _finalize():
        lane_id = jax.lax.broadcasted_iota(jnp.int32, (1, 8, LANE), 2)
        vec = (jnp.where(lane_id == 0, jnp.sum(bce_acc[...]), 0.0)
               + jnp.where(lane_id == 1, jnp.sum(cnt_acc[...]), 0.0))
        if include_aolp:
            vec = (vec
                   + jnp.where(lane_id == 2, jnp.sum(aolp_acc[...]), 0.0)
                   + jnp.where(lane_id == 3, jnp.sum(sel_acc[...]), 0.0))
        out_ref[...] = vec


def _run_pir_kernel(sdf, net, obj, aolp_pred, aolp_gt, refl, trans,
                    alpha, include_aolp, num_slices=None):
    n = int(sdf.shape[0])
    if num_slices is None:
        num_slices = _default_num_slices()

    rows = max(1, -(-n // LANE))
    if rows < ROW_ALIGN:
        # Tiny input: pad up to a single 32x128 tile (a few KiB, negligible).
        rows_store = ROW_ALIGN
        row_tile = ROW_ALIGN
    else:
        # Large input: no row padding.  The tile is a multiple of 32 rows and
        # <= rows, so every block start is in-bounds; the last block may be
        # partial and is handled by the in-kernel gidx mask.
        rows_store = rows
        max_tile = MAX_ROW_TILE_AOLP if include_aolp else MAX_ROW_TILE
        row_tile = min(max_tile, (rows // ROW_ALIGN) * ROW_ALIGN)
    steps_total = -(-rows_store // row_tile)
    num_slices = max(1, min(int(num_slices), steps_total))
    per_slice = -(-steps_total // num_slices)

    n_store = rows_store * LANE

    def to2d(x, dtype):
        # Free view-reshape when N is a multiple of 128 (the common case);
        # otherwise a small tail pad (one extra copy only in the ragged case).
        x = x.reshape(-1).astype(dtype)
        if n_store != n:
            x = jnp.pad(x, (0, n_store - n))
        return x.reshape(rows_store, LANE)

    inputs = [to2d(sdf, jnp.float32),
              to2d(net, jnp.int8),
              to2d(obj, jnp.int8)]
    if include_aolp:
        inputs += [to2d(aolp_pred, jnp.float32), to2d(aolp_gt, jnp.float32),
                   to2d(refl, jnp.float32), to2d(trans, jnp.float32)]

    if num_slices * per_slice == steps_total:
        def in_idx(c, i):
            return (c * per_slice + i, 0)
    else:
        # The grid over-covers by < num_slices blocks: clamp the DMA source so
        # it stays in-bounds; duplicate blocks are zeroed by the gidx mask.
        def in_idx(c, i):
            return (jnp.minimum(c * per_slice + i, steps_total - 1), 0)

    in_specs = [pl.BlockSpec((row_tile, LANE), in_idx) for _ in inputs]
    n_acc = 4 if include_aolp else 2

    out = pl.pallas_call(
        functools.partial(_pir_kernel, float(alpha), n, include_aolp),
        out_shape=jax.ShapeDtypeStruct((num_slices, 8, LANE), jnp.float32),
        grid=(num_slices, per_slice),
        in_specs=in_specs,
        out_specs=pl.BlockSpec((1, 8, LANE), lambda c, i: (c, 0, 0)),
        scratch_shapes=[pltpu.VMEM((8, LANE), jnp.float32)] * n_acc,
        compiler_params=pltpu.CompilerParams(
            dimension_semantics=("parallel", "arbitrary")),
    )(*inputs)

    row0 = out[:, 0, :]                       # (num_slices, LANE)
    bce_sum = jnp.sum(row0[:, 0])
    bce_cnt = jnp.sum(row0[:, 1])
    aolp_sum = jnp.sum(row0[:, 2])
    sel_cnt = jnp.sum(row0[:, 3])
    return bce_sum, bce_cnt, aolp_sum, sel_cnt


def _eikonal_loss(grad_theta):
    # Tiny (M, 3) reduce done as plain XLA (per the perf review) instead of a
    # serialized kernel epilogue at ~2% lane utilization.
    if grad_theta.shape[0] == 0:
        return jnp.float32(0.0)
    g = grad_theta.astype(jnp.float32)
    norms = jnp.sqrt(jnp.sum(g * g, axis=1))
    return jnp.mean((norms - 1.0) ** 2)


def pir_loss_forward(model_inputs, model_outputs, ground_truth,
                     eikonal_weight=0.1, mask_weight=100.0,
                     aolp_render_weight_init=1.0, alpha=50.0):
    # The PyTorch module sets self.aolp_render_weight = 0.0 in __init__ and
    # never updates it inside forward(); aolp_render_weight_init is stored but
    # unused.  The aolp branch is therefore statically gated off (its inputs
    # are never even read) - flip aolp_render_weight to re-enable it.
    aolp_render_weight = 0.0
    include_aolp = (aolp_render_weight != 0.0)

    aolp_gt_2d = ground_truth['aolp'][:, :, 0]                    # (B, N)
    net = model_outputs['network_object_mask'].reshape(-1)
    obj = model_outputs['object_mask'].reshape(-1)
    sdf = model_outputs['sdf_output'].reshape(-1)
    grad_theta = model_outputs['grad_theta']
    n_rays = obj.shape[0]

    if include_aolp:
        aolp_pred = model_outputs['aolp_render'].reshape(-1)
        refl = model_outputs['reflection_intensity'].reshape(-1)
        trans = model_outputs['transmittance_intensity'].reshape(-1)
        aolp_gt = aolp_gt_2d.reshape(-1)
    else:
        aolp_pred = aolp_gt = refl = trans = None

    bce_sum, bce_cnt, aolp_sum, sel_cnt = _run_pir_kernel(
        sdf, net, obj, aolp_pred, aolp_gt, refl, trans, alpha, include_aolp)

    # mask_loss = (1/alpha) * BCE_sum / N, or 0 if no element is selected
    mask_loss = jnp.where(bce_cnt > 0.0,
                          (1.0 / alpha) * bce_sum / float(n_rays),
                          jnp.float32(0.0))

    if aolp_gt_2d.shape[1] > 20480:
        eikonal_loss = mask_loss
    else:
        eikonal_loss = _eikonal_loss(grad_theta)

    if include_aolp:
        # module normalizes by object_mask.shape[0], not by the selected count
        aolp_render_loss = jnp.where(sel_cnt > 0.0,
                                     aolp_sum / float(n_rays),
                                     jnp.float32(0.0))
    else:
        aolp_render_loss = jnp.float32(0.0)

    loss = (mask_weight * mask_loss
            + eikonal_weight * eikonal_loss
            + aolp_render_weight * aolp_render_loss)

    return {'loss': loss,
            'aolp_render_loss': aolp_render_weight * aolp_render_loss,
            'eikonal_loss': eikonal_weight * eikonal_loss,
            'mask_loss': mask_weight * mask_loss}


if __name__ == "__main__":
    key = jax.random.PRNGKey(0)
    N = 2048   # number of rays
    M = 256    # eikonal sample points

    keys = jax.random.split(key, 12)
    ground_truth = {
        'normal': jax.random.normal(keys[0], (1, N, 3), jnp.float32),
        'aolp': jax.random.uniform(keys[1], (1, N, 3), jnp.float32,
                                   minval=-0.2, maxval=float(jnp.pi)),
        'dolp': jax.random.uniform(keys[2], (1, N, 3), jnp.float32),
        'rgb': jax.random.uniform(keys[3], (1, N, 3), jnp.float32,
                                  minval=-1.0, maxval=1.0),
    }
    model_outputs = {
        'network_object_mask': jax.random.bernoulli(keys[4], 0.6, (N,)),
        'object_mask': jax.random.bernoulli(keys[5], 0.6, (N,)),
        'sdf_output': jax.random.normal(keys[6], (N, 1), jnp.float32) * 0.1,
        'grad_theta': jax.random.normal(keys[7], (M, 3), jnp.float32),
        'reflection_intensity': jax.random.uniform(keys[8], (N, 1), jnp.float32),
        'transmittance_intensity': jax.random.uniform(keys[9], (N, 1), jnp.float32),
        'aolp_render': jax.random.uniform(keys[10], (N, 1), jnp.float32,
                                          minval=0.0, maxval=float(jnp.pi)),
        'normals': jax.random.normal(keys[11], (N, 3), jnp.float32),
        's0': jax.random.uniform(jax.random.fold_in(key, 100), (N, 1), jnp.float32),
    }
    model_inputs = {'pose': jnp.eye(4, dtype=jnp.float32)[None]}

    out = pir_loss_forward(model_inputs, model_outputs, ground_truth,
                           eikonal_weight=0.1, mask_weight=100.0,
                           aolp_render_weight_init=1.0, alpha=50.0)
    out = jax.tree_util.tree_map(jax.block_until_ready, out)
    print("KERNEL_OK")
</pallas_src>

<mosaic_0001>
module attributes {stable_mosaic.version = 11 : i64} {
  func.func @_pir_kernel(%arg0: i32, %arg1: i32, %arg2: memref<32x128xf32, #tpu.memory_space<vmem>>, %arg3: memref<32x128xi8, #tpu.memory_space<vmem>>, %arg4: memref<32x128xi8, #tpu.memory_space<vmem>>, %arg5: memref<1x8x128xf32, #tpu.memory_space<vmem>>, %arg6: memref<8x128xf32, #tpu.memory_space<vmem>>, %arg7: memref<8x128xf32, #tpu.memory_space<vmem>>) attributes {dimension_semantics = [#tpu.dimension_semantics<parallel>, #tpu.dimension_semantics<arbitrary>], iteration_bounds = array<i64: 1, 1>, scalar_prefetch = 0 : i64, scratch_operands = 2 : i64, tpu.core_type = #tpu.core_type<tc>, window_params = [{transform_indices = @transform_0, window_bounds = array<i64: 32, 128>}, {transform_indices = @transform_1, window_bounds = array<i64: 32, 128>}, {transform_indices = @transform_2, window_bounds = array<i64: 32, 128>}, {transform_indices = @transform_3, window_bounds = array<i64: 1, 8, 128>}]} {
    %c0_i32 = arith.constant 0 : i32
    %0 = arith.cmpi eq, %arg1, %c0_i32 : i32
    %1 = arith.extui %0 : i1 to i32
    %c0_i32_0 = arith.constant 0 : i32
    %2 = arith.cmpi ne, %1, %c0_i32_0 : i32
    scf.if %2 {
      %cst_23 = arith.constant 0.000000e+00 : f32
      %53 = vector.broadcast %cst_23 : f32 to vector<8x128xf32>
      %c0_24 = arith.constant 0 : index
      %c0_25 = arith.constant 0 : index
      %54 = vector.load %arg6[%c0_24, %c0_25] : memref<8x128xf32, #tpu.memory_space<vmem>>, vector<8x128xf32>
      tpu.vector_store %arg6[%c0_24, %c0_25], %53 {strides = array<i32>} : memref<8x128xf32, #tpu.memory_space<vmem>>, vector<8x128xf32>,
      %cst_26 = arith.constant 0.000000e+00 : f32
      %55 = vector.broadcast %cst_26 : f32 to vector<8x128xf32>
      %c0_27 = arith.constant 0 : index
      %c0_28 = arith.constant 0 : index
      %56 = vector.load %arg7[%c0_27, %c0_28] : memref<8x128xf32, #tpu.memory_space<vmem>>, vector<8x128xf32>
      tpu.vector_store %arg7[%c0_27, %c0_28], %55 {strides = array<i32>} : memref<8x128xf32, #tpu.memory_space<vmem>>, vector<8x128xf32>,
    } else {
    }
    %c1_i32 = arith.constant 1 : i32
    %3 = arith.muli %arg0, %c1_i32 : i32
    %4 = arith.addi %3, %arg1 : i32
    %5 = tpu.iota {dimensions = array<i32: 0>} : vector<32x128xi32>
    %6 = tpu.iota {dimensions = array<i32: 1>} : vector<32x128xi32>
    %c32_i32 = arith.constant 32 : i32
    %7 = arith.muli %4, %c32_i32 : i32
    %8 = vector.broadcast %7 : i32 to vector<32x128xi32>
    %9 = arith.addi %8, %5 : vector<32x128xi32>
    %c128_i32 = arith.constant 128 : i32
    %10 = vector.broadcast %c128_i32 : i32 to vector<32x128xi32>
    %11 = arith.muli %9, %10 : vector<32x128xi32>
    %12 = arith.addi %11, %6 : vector<32x128xi32>
    %c2048_i32 = arith.constant 2048 : i32
    %13 = vector.broadcast %c2048_i32 : i32 to vector<32x128xi32>
    %14 = arith.cmpi slt, %12, %13 : vector<32x128xi32>
    %c0 = arith.constant 0 : index
    %c0_1 = arith.constant 0 : index
    %15 = vector.load %arg2[%c0, %c0_1] : memref<32x128xf32, #tpu.memory_space<vmem>>, vector<32x128xf32>
    %c0_2 = arith.constant 0 : index
    %c0_3 = arith.constant 0 : index
    %16 = vector.load %arg3[%c0_2, %c0_3] : memref<32x128xi8, #tpu.memory_space<vmem>>, vector<32x128xi8>
    %17 = arith.sitofp %16 : vector<32x128xi8> to vector<32x128xf32>
    %c0_4 = arith.constant 0 : index
    %c0_5 = arith.constant 0 : index
    %18 = vector.load %arg4[%c0_4, %c0_5] : memref<32x128xi8, #tpu.memory_space<vmem>>, vector<32x128xi8>
    %19 = arith.sitofp %18 : vector<32x128xi8> to vector<32x128xf32>
    %20 = arith.mulf %17, %19 : vector<32x128xf32>
    %cst = arith.constant 1.000000e+00 : f32
    %21 = vector.broadcast %cst : f32 to vector<32x128xf32>
    %22 = arith.subf %21, %20 : vector<32x128xf32>
    %cst_6 = arith.constant -5.000000e+01 : f32
    %23 = vector.broadcast %cst_6 : f32 to vector<32x128xf32>
    %24 = arith.mulf %23, %15 : vector<32x128xf32>
    %cst_7 = arith.constant 0.000000e+00 : f32
    %25 = vector.broadcast %cst_7 : f32 to vector<32x128xf32>
    %26 = arith.maximumf %24, %25 : vector<32x128xf32>
    %27 = arith.mulf %24, %19 : vector<32x128xf32>
    %28 = arith.subf %26, %27 : vector<32x128xf32>
    %29 = math.absf %24 : vector<32x128xf32>
    %cst_8 = arith.constant 0.000000e+00 : f32
    %30 = vector.broadcast %cst_8 : f32 to vector<32x128xf32>
    %31 = arith.subf %30, %29 : vector<32x128xf32>
    %32 = math.exp %31 : vector<32x128xf32>
    %33 = math.log1p %32 : vector<32x128xf32>
    %34 = arith.addf %28, %33 : vector<32x128xf32>
    %35 = arith.mulf %34, %22 : vector<32x128xf32>
    %cst_9 = arith.constant 0.000000e+00 : f32
    %36 = vector.broadcast %cst_9 : f32 to vector<32x128xf32>
    %37 = arith.select %14, %35, %36 : vector<32x128xi1>, vector<32x128xf32>
    %cst_10 = arith.constant 0.000000e+00 : f32
    %38 = vector.broadcast %cst_10 : f32 to vector<32x128xf32>
    %39 = arith.select %14, %22, %38 : vector<32x128xi1>, vector<32x128xf32>
    %c0_11 = arith.constant 0 : index
    %c0_12 = arith.constant 0 : index
    %40 = vector.load %arg6[%c0_11, %c0_12] : memref<8x128xf32, #tpu.memory_space<vmem>>, vector<8x128xf32>
    %41 = vector.shape_cast %37 : vector<32x128xf32> to vector<4x8x128xf32>
    %cst_13 = arith.constant dense<0.000000e+00> : vector<8x128xf32>
    %42 = vector.multi_reduction <add>, %41, %cst_13 [0] : vector<4x8x128xf32> to vector<8x128xf32>
    %43 = arith.addf %40, %42 : vector<8x128xf32>
    %c0_14 = arith.constant 0 : index
    %c0_15 = arith.constant 0 : index
    %44 = vector.load %arg6[%c0_14, %c0_15] : memref<8x128xf32, #tpu.memory_space<vmem>>, vector<8x128xf32>
    tpu.vector_store %arg6[%c0_14, %c0_15], %43 {strides = array<i32>} : memref<8x128xf32, #tpu.memory_space<vmem>>, vector<8x128xf32>,
    %c0_16 = arith.constant 0 : index
    %c0_17 = arith.constant 0 : index
    %45 = vector.load %arg7[%c0_16, %c0_17] : memref<8x128xf32, #tpu.memory_space<vmem>>, vector<8x128xf32>
    %46 = vector.shape_cast %39 : vector<32x128xf32> to vector<4x8x128xf32>
    %cst_18 = arith.constant dense<0.000000e+00> : vector<8x128xf32>
    %47 = vector.multi_reduction <add>, %46, %cst_18 [0] : vector<4x8x128xf32> to vector<8x128xf32>
    %48 = arith.addf %45, %47 : vector<8x128xf32>
    %c0_19 = arith.constant 0 : index
    %c0_20 = arith.constant 0 : index
    %49 = vector.load %arg7[%c0_19, %c0_20] : memref<8x128xf32, #tpu.memory_space<vmem>>, vector<8x128xf32>
    tpu.vector_store %arg7[%c0_19, %c0_20], %48 {strides = array<i32>} : memref<8x128xf32, #tpu.memory_space<vmem>>, vector<8x128xf32>,
    %c0_i32_21 = arith.constant 0 : i32
    %50 = arith.cmpi eq, %arg1, %c0_i32_21 : i32
    %51 = arith.extui %50 : i1 to i32
    %c0_i32_22 = arith.constant 0 : i32
    %52 = arith.cmpi ne, %51, %c0_i32_22 : i32
    scf.if %52 {
      %53 = tpu.iota {dimensions = array<i32: 2>} : vector<1x8x128xi32>
      %c0_i32_23 = arith.constant 0 : i32
      %54 = vector.broadcast %c0_i32_23 : i32 to vector<1x8x128xi32>
      %55 = arith.cmpi eq, %53, %54 : vector<1x8x128xi32>
      %c0_24 = arith.constant 0 : index
      %c0_25 = arith.constant 0 : index
      %56 = vector.load %arg6[%c0_24, %c0_25] : memref<8x128xf32, #tpu.memory_space<vmem>>, vector<8x128xf32>
      %57 = vector.shape_cast %56 : vector<8x128xf32> to vector<1x8x128xf32>
      %cst_26 = arith.constant dense<0.000000e+00> : vector<1xf32>
      %58 = vector.multi_reduction <add>, %57, %cst_26 [1, 2] : vector<1x8x128xf32> to vector<1xf32>
      %59 = vector.shape_cast %58 : vector<1xf32> to vector<1x1x1xf32>
      %60 = vector.extract %59[0, 0, 0] : f32 from vector<1x1x1xf32>
      %cst_27 = arith.constant 0.000000e+00 : f32
      %61 = vector.broadcast %60 : f32 to vector<1x8x128xf32>
      %62 = vector.broadcast %cst_27 : f32 to vector<1x8x128xf32>
      %63 = arith.select %55, %61, %62 : vector<1x8x128xi1>, vector<1x8x128xf32>
      %c1_i32_28 = arith.constant 1 : i32
      %64 = vector.broadcast %c1_i32_28 : i32 to vector<1x8x128xi32>
      %65 = arith.cmpi eq, %53, %64 : vector<1x8x128xi32>
      %c0_29 = arith.constant 0 : index
      %c0_30 = arith.constant 0 : index
      %66 = vector.load %arg7[%c0_29, %c0_30] : memref<8x128xf32, #tpu.memory_space<vmem>>, vector<8x128xf32>
      %67 = vector.shape_cast %66 : vector<8x128xf32> to vector<1x8x128xf32>
      %cst_31 = arith.constant dense<0.000000e+00> : vector<1xf32>
      %68 = vector.multi_reduction <add>, %67, %cst_31 [1, 2] : vector<1x8x128xf32> to vector<1xf32>
      %69 = vector.shape_cast %68 : vector<1xf32> to vector<1x1x1xf32>
      %70 = vector.extract %69[0, 0, 0] : f32 from vector<1x1x1xf32>
      %cst_32 = arith.constant 0.000000e+00 : f32
      %71 = vector.broadcast %70 : f32 to vector<1x8x128xf32>
      %72 = vector.broadcast %cst_32 : f32 to vector<1x8x128xf32>
      %73 = arith.select %65, %71, %72 : vector<1x8x128xi1>, vector<1x8x128xf32>
      %74 = arith.addf %63, %73 : vector<1x8x128xf32>
      %c0_33 = arith.constant 0 : index
      %c0_34 = arith.constant 0 : index
      %c0_35 = arith.constant 0 : index
      %75 = vector.load %arg5[%c0_33, %c0_34, %c0_35] : memref<1x8x128xf32, #tpu.memory_space<vmem>>, vector<1x8x128xf32>
      tpu.vector_store %arg5[%c0_33, %c0_34, %c0_35], %74 {strides = array<i32>} : memref<1x8x128xf32, #tpu.memory_space<vmem>>, vector<1x8x128xf32>,
    } else {
    }
    return
  }
  func.func @transform_0(%arg0: i32, %arg1: i32) -> (i32, i32) {
    %c1_i32 = arith.constant 1 : i32
    %0 = arith.muli %arg0, %c1_i32 : i32
    %1 = arith.addi %0, %arg1 : i32
    %c0_i32 = arith.constant 0 : i32
    %c0_i32_0 = arith.constant 0 : i32
    return %1, %c0_i32 : i32, i32
  }
  func.func @transform_1(%arg0: i32, %arg1: i32) -> (i32, i32) {
    %c1_i32 = arith.constant 1 : i32
    %0 = arith.muli %arg0, %c1_i32 : i32
    %1 = arith.addi %0, %arg1 : i32
    %c0_i32 = arith.constant 0 : i32
    %c0_i32_0 = arith.constant 0 : i32
    return %1, %c0_i32 : i32, i32
  }
  func.func @transform_2(%arg0: i32, %arg1: i32) -> (i32, i32) {
    %c1_i32 = arith.constant 1 : i32
    %0 = arith.muli %arg0, %c1_i32 : i32
    %1 = arith.addi %0, %arg1 : i32
    %c0_i32 = arith.constant 0 : i32
    %c0_i32_0 = arith.constant 0 : i32
    return %1, %c0_i32 : i32, i32
  }
  func.func @transform_3(%arg0: i32, %arg1: i32) -> (i32, i32, i32) {
    %c0_i32 = arith.constant 0 : i32
    %c0_i32_0 = arith.constant 0 : i32
    %c0_i32_1 = arith.constant 0 : i32
    return %arg0, %c0_i32, %c0_i32_0 : i32, i32, i32
  }
}

</mosaic_0001>

<bundles_post_ra>
// kernel: tpu_custom_call.1
= control target key start
LH: loop header
LB: loop body
LE: loop exit
PB: predicated region body
PF: predicated region fallthrough
CT: control target
= control target key end

     0   :  { %8 = vsyncpa [#allocation5], 0  ;;  %s538_s0 = inlined_call_operand.hbm [shape: f32[32,128], index: 0, kind: input, shape index: {}]   ;;  %s539_s1 = inlined_call_operand.hbm [shape: s8[32,128], index: 1, kind: input, shape index: {}]   ;;  %s540_s2 = inlined_call_operand.hbm [shape: s8[32,128], index: 2, kind: input, shape index: {}]   ;;  %s541_s3 = inlined_call_operand.hbm [shape: f32[1,8,128], index: 3, kind: output, shape index: {}]  }
   0x1   :  { %9 = vsyncpa [#allocation8], 0 }
   0x2   :  { %10 = vsyncpa [#allocation6], 0  ;;  %s391_s12 = smov [#allocation7]   ;;  %s392_s14 = smov [#allocation4]  }
   0x3   :  { %s36_s13 = sshll.u32 %s391_s12, 4  ;;  %s20_s15 = sshll.u32 %s392_s14, 4  ;;  %s37_s13 = int_to_ptr.vmem [resolvable:$true] %s36_s13  ;;  %s417_s15 = int_to_ptr.vmem [resolvable:$true] %s20_s15 }
   0x4   :  { %s297_s18 = scalar_lea.hbm %s539_s1, 128 }
   0x5   :  { %p298_p0 = scmp.ne.s32.totalorder %s539_s1, %s297_s18  ;;  %p301_p1 = scmp.lt.u32.totalorder %s297_s18, %s539_s1 }
   0x7   :  { %p303_p2 = pnand %p301_p1, %p298_p0 }
   0x9   :  { %306 = shalt.err (!%p303_p2)
}
   0xa   :  { %s307_s23 = scalar_lea.vmem %s37_s13, 128  ;;  %p312_p4 = scmp.lt.s32.totalorder %s37_s13, %s37_s13 }
   0xb   :  { %p308_p3 = scmp.ne.s32.totalorder %s37_s13, %s307_s23  ;;  %p313_p5 = scmp.lt.s32.totalorder %s307_s23, %s307_s23 }
   0xd   :  { %p314_p6 = por %p313_p5, %p312_p4 }
   0xf   :  { %p315_p7 = pnand %p314_p6, %p308_p3 }
  0x11   :  { %318 = shalt.err (!%p315_p7)
}
  0x12   :  { %39 = dma.hbm_to_vmem [thread:$0]  %s539_s1, 128, %s37_s13, [#allocation8]  }
  0x13   :  { %s319_s28 = scalar_lea.hbm %s538_s0, 512 }
  0x14   :  { %p320_p8 = scmp.ne.s32.totalorder %s538_s0, %s319_s28  ;;  %p323_p9 = scmp.lt.u32.totalorder %s319_s28, %s538_s0 }
  0x16   :  { %p325_p10 = pnand %p323_p9, %p320_p8 }
  0x18   :  { %328 = shalt.err (!%p325_p10)
}
  0x19   :  { %s329_s6 = scalar_lea.vmem %s417_s15, 512  ;;  %p334_p12 = scmp.lt.s32.totalorder %s417_s15, %s417_s15 }
  0x1a   :  { %p330_p11 = scmp.ne.s32.totalorder %s417_s15, %s329_s6  ;;  %p335_p13 = scmp.lt.s32.totalorder %s329_s6, %s329_s6 }
  0x1c   :  { %p336_p0 = por %p335_p13, %p334_p12 }
  0x1e   :  { %p337_p1 = pnand %p336_p0, %p330_p11 }
  0x20   :  { %340 = shalt.err (!%p337_p1)
}
  0x21   :  { %s393_s1 = smov 128   ;;  %s394_s7 = smov 8  }
  0x22   :  { %26 = dma.hbm_to_vmem [thread:$0]  %s538_s0, 512, %s417_s15, [#allocation5], %s393_s1, %s393_s1, %s394_s7  }
  0x23   :  { %s395_s10 = smov [#allocation9]   ;;  %s341_s14 = scalar_lea.hbm %s540_s2, 128 }
  0x24   :  { %s49_s11 = sshll.u32 %s395_s10, 4  ;;  %p342_p2 = scmp.ne.s32.totalorder %s540_s2, %s341_s14  ;;  %s50_s11 = int_to_ptr.vmem [resolvable:$true] %s49_s11 }
  0x25   :  { %p345_p3 = scmp.lt.u32.totalorder %s341_s14, %s540_s2 }
  0x27   :  { %p347_p4 = pnand %p345_p3, %p342_p2 }
  0x29   :  { %350 = shalt.err (!%p347_p4)
}
  0x2a   :  { %s351_s20 = scalar_lea.vmem %s50_s11, 128  ;;  %p356_p6 = scmp.lt.s32.totalorder %s50_s11, %s50_s11 }
  0x2b   :  { %p352_p5 = scmp.ne.s32.totalorder %s50_s11, %s351_s20  ;;  %p357_p7 = scmp.lt.s32.totalorder %s351_s20, %s351_s20 }
  0x2d   :  { %p358_p8 = por %p357_p7, %p356_p6 }
  0x2f   :  { %p359_p9 = pnand %p358_p8, %p352_p5 }
  0x31   :  { %362 = shalt.err (!%p359_p9)
}
  0x32   :  { %52 = dma.hbm_to_vmem [thread:$0]  %s540_s2, 128, %s50_s11, [#allocation8]  }
  0x33   :  { %385 = dma.done.wait [#allocation5], 512  }
  0x34   :  { %386 = vsyncadd [#allocation5], 4294966784 }
  0x35   :  { %387 = dma.done.wait [#allocation8], 256  }
  0x36   :  { %388 = vsyncadd [#allocation8], 4294967040  ;;  %v98_v0 = vld [vmem:[#allocation4] sm:$0xff]  ;;  %v99_v1 = vld [vmem:[#allocation4 + $0x8] sm:$0xff]  ;;  %v73_v8 = vlaneseq  ;;  %s396_s22 = smov [#allocation10]  }
  0x37   :  { %v100_v2 = vld [vmem:[#allocation4 + $0x10] sm:$0xff]  ;;  %v101_v3 = vld [vmem:[#allocation4 + $0x18] sm:$0xff]  ;;  %v460_v4 = vmul.f32 -50.0, %v98_v0  ;;  %v462_v5 = vmul.f32 -50.0, %v99_v1  ;;  %v102_v28 = vld [vmem:[#allocation7] sm:$0xff]  ;;  %s261_s23 = sshll.u32 %s396_s22, 4  ;;  %s262_s23 = int_to_ptr.vmem [resolvable:$true] %s261_s23 }
  0x38   :  { %v464_v6 = vmul.f32 -50.0, %v100_v2  ;;  %v466_v7 = vmul.f32 -50.0, %v101_v3  ;;  %v74_v17 = vshrl.u32 %v73_v8, 7  ;;  %v472_v25 = vand.u32 127, %v73_v8  ;;  %v111_v31 = vld [vmem:[#allocation9] sm:$0xff]  ;;  %s363_s24 = scalar_lea.vmem %s262_s23, 128  ;;  %p368_p11 = scmp.lt.s32.totalorder %s262_s23, %s262_s23 }
  0x39   :  { %v144_v9 = vand.u32 2147483647, %v460_v4  ;;  %v145_v10 = vand.u32 2147483647, %v462_v5  ;;  %v103_v32 = vunpack.c.0.s8 %v102_v28  ;;  %v104_v33 = vunpack.c.1.s8 %v102_v28  ;;  %p364_p10 = scmp.ne.s32.totalorder %s262_s23, %s363_s24  ;;  %p369_p12 = scmp.lt.s32.totalorder %s363_s24, %s363_s24 }
  0x3a   :  { %v146_v11 = vand.u32 2147483647, %v464_v6  ;;  %v147_v12 = vand.u32 2147483647, %v466_v7  ;;  %v75_v22 = vadd.s32 8, %v74_v17  ;;  %v76_v23 = vadd.s32 16, %v74_v17 }
  0x3b   :  { %v148_v13 = vsub.f32 0.0, %v144_v9  ;;  %v149_v14 = vsub.f32 0.0, %v145_v10  ;;  %v77_v24 = vadd.s32 24, %v74_v17  ;;  %v86_v26 = vmul.u32 128, %v74_v17  ;;  %p370_p13 = por %p369_p12, %p368_p11 }
  0x3c   :  { %v150_v15 = vsub.f32 0.0, %v146_v11  ;;  %v151_v16 = vsub.f32 0.0, %v147_v12  ;;  %v87_v27 = vmul.u32 128, %v75_v22  ;;  %v88_v29 = vmul.u32 128, %v76_v23 }
  0x3d   :  { %v152_v18 = vmul.f32 1.442695, %v148_v13  ;;  %v154_v19 = vmul.f32 1.442695, %v149_v14  ;;  %v89_v30 = vmul.u32 128, %v77_v24  ;;  %v475_v35 = vadd.s32 %v86_v26, %v472_v25  ;;  %p371_p0 = pnand %p370_p13, %p364_p10 }
  0x3e   :  { %v156_v20 = vmul.f32 1.442695, %v150_v15  ;;  %v158_v21 = vmul.f32 1.442695, %v151_v16  ;;  %v478_v36 = vadd.s32 %v87_v27, %v472_v25  ;;  %v105_v37 = vunpack.c.2.s8 %v102_v28 }
  0x3f   :  { %281 = vpow2.f32 %v152_v18  ;;  %v106_v38 = vunpack.c.3.s8 %v102_v28  ;;  %v481_v40 = vadd.s32 %v88_v29, %v472_v25  ;;  %v484_v41 = vadd.s32 %v89_v30, %v472_v25 }
  0x40   :  { %283 = vpow2.f32 %v154_v19  ;;  %v112_v42 = vunpack.c.0.s8 %v111_v31  ;;  %v113_v45 = vunpack.c.1.s8 %v111_v31  ;;  %v114_v46 = vunpack.c.2.s8 %v111_v31 }
  0x41   :  { %285 = vpow2.f32 %v156_v20  ;;  %v115_v47 = vunpack.c.3.s8 %v111_v31  ;;  %v107_v50 = vcvt.s32.f32 %v103_v32  ;;  %v108_v51 = vcvt.s32.f32 %v104_v33 }
  0x42   :  { %287 = vpow2.f32 %v158_v21  ;;  %v109_v53 = vcvt.s32.f32 %v105_v37  ;;  %v110_v54 = vcvt.s32.f32 %v106_v38  ;;  %v116_v56 = vcvt.s32.f32 %v112_v42 }
  0x43   :  { %v117_v59 = vcvt.s32.f32 %v113_v45  ;;  %v118_v60 = vcvt.s32.f32 %v114_v46  ;;  %v119_v61 = vcvt.s32.f32 %v115_v47  ;;  %v132_v0 = vmax.f32 %v460_v4, 0.0 }
  0x44   :  { %v120_v63 = vmul.f32 %v116_v56, %v107_v50  ;;  %v133_v1 = vmax.f32 %v462_v5, 0.0  ;;  %vm94_vm0 = vcmp.lt.s32.totalorder %v475_v35, 2048  ;;  %v134_v3 = vmax.f32 %v464_v6, 0.0 }
  0x45   :  { %v121_v2 = vmul.f32 %v117_v59, %v108_v51  ;;  %vm95_vm1 = vcmp.lt.s32.totalorder %v478_v36, 2048  ;;  %v135_v10 = vmax.f32 %v466_v7, 0.0  ;;  %v136_v11 = vmul.f32 %v460_v4, %v116_v56 }
  0x46   :  { %v122_v14 = vmul.f32 %v118_v60, %v109_v53  ;;  %v137_v15 = vmul.f32 %v462_v5, %v117_v59  ;;  %v123_v18 = vmul.f32 %v119_v61, %v110_v54  ;;  %v124_v19 = vsub.f32 1.0, %v120_v63 }
  0x47   :  { %v138_v20 = vmul.f32 %v464_v6, %v118_v60  ;;  %v125_v22 = vsub.f32 1.0, %v121_v2  ;;  %v139_v23 = vmul.f32 %v466_v7, %v119_v61  ;;  %v140_v28 = vsub.f32 %v132_v0, %v136_v11 }
  0x48   :  { %v141_v31 = vsub.f32 %v133_v1, %v137_v15  ;;  %v127_v54 = vsub.f32 1.0, %v123_v18  ;;  %vm96_vm6 = vcmp.lt.s32.totalorder %v481_v40, 2048  ;;  %vm97_vm7 = vcmp.lt.s32.totalorder %v484_v41, 2048 }
  0x49   :  { %v282_v34 = vpop.eup %281  ;;  %v142_v37 = vsub.f32 %v134_v3, %v138_v20  ;;  %v143_v42 = vsub.f32 %v135_v10, %v139_v23  ;;  %v209_v53 = vsel %vm95_vm1, %v125_v22, 0.0  ;;  %vm227_vm8 = vcmp.eq.s32.totalorder %v472_v25, 0 }
  0x4a   :  { %v284_v39 = vpop.eup %283  ;;  %v160_v43 = vadd.f32 1.0, %v282_v34  ;;  %v163_v55 = vmul.f32 -0.5, %v282_v34  ;;  %v166_v12 = vand.u32 2147483647, %v282_v34  ;;  %vm240_vm9 = vcmp.eq.s32.totalorder %v472_v25, 1 }
  0x4b   :  { %v286_v44 = vpop.eup %285  ;;  %v169_v48 = vadd.f32 1.0, %v284_v39  ;;  %v172_v57 = vmul.f32 -0.5, %v284_v39  ;;  %v175_v16 = vand.u32 2147483647, %v284_v39 }
  0x4c   :  { %v486_v49 = vpop.eup %287  ;;  %289 = vlog2.f32 %v160_v43  ;;  %v178_v52 = vadd.f32 1.0, %v286_v44  ;;  %v181_v62 = vmul.f32 -0.5, %v286_v44  ;;  %v164_v8 = vadd.f32 1.0, %v163_v55 }
  0x4d   :  { %291 = vlog2.f32 %v169_v48  ;;  %v187_v58 = vadd.f32 1.0, %v486_v49  ;;  %v190_v9 = vmul.f32 -0.5, %v486_v49  ;;  %v173_v13 = vadd.f32 1.0, %v172_v57 }
  0x4e   :  { %293 = vlog2.f32 %v178_v52  ;;  %v182_v17 = vadd.f32 1.0, %v181_v62  ;;  %v184_v21 = vand.u32 2147483647, %v286_v44  ;;  %v165_v24 = vmul.f32 %v282_v34, %v164_v8 }
  0x4f   :  { %295 = vlog2.f32 %v187_v58  ;;  %v191_v26 = vadd.f32 1.0, %v190_v9  ;;  %vm500_vm2 = vcmp.lt.f32.partialorder %v166_v12, 0.0004427343  ;;  %v174_v29 = vmul.f32 %v284_v39, %v173_v13 }
  0x50   :  { %v193_v5 = vand.u32 2147483647, %v486_v49  ;;  %vm505_vm3 = vcmp.lt.f32.partialorder %v175_v16, 0.0004427343  ;;  %v183_v33 = vmul.f32 %v286_v44, %v182_v17  ;;  %v126_v34 = vsub.f32 1.0, %v122_v14 }
  0x51   :  { %vm185_vm4 = vcmp.lt.f32.partialorder %v184_v21, 0.0004427343  ;;  %v192_v45 = vmul.f32 %v486_v49, %v191_v26  ;;  %v208_v44 = vsel %vm94_vm0, %v124_v19, 0.0  ;;  %v211_v9 = vsel %vm97_vm7, %v127_v54, 0.0 }
  0x52   :  { %vm194_vm5 = vcmp.lt.f32.partialorder %v193_v5, 0.0004427343  ;;  %v219_v61 = vadd.f32 %v209_v53, %v208_v44  ;;  %v210_v63 = vsel %vm96_vm6, %v126_v34, 0.0 }
  0x54   :  { %v220_v40 = vadd.f32 %v219_v61, %v210_v63 }
  0x56   :  { %v290_v27 = vpop.eup %289  ;;  %v221_v11 = vadd.f32 %v220_v40, %v211_v9 }
  0x57   :  { %v292_v30 = vpop.eup %291  ;;  %v162_v32 = vmul.f32 0.6931472, %v290_v27 }
  0x58   :  { %v294_v7 = vpop.eup %293  ;;  %v171_v38 = vmul.f32 0.6931472, %v292_v30 }
  0x59   :  { %v168_v43 = vsel %vm500_vm2, %v165_v24, %v162_v32  ;;  %v180_v39 = vmul.f32 0.6931472, %v294_v7  ;;  %v296_v46 = vpop.eup %295 }
  0x5a   :  { %v177_v47 = vsel %vm505_vm3, %v174_v29, %v171_v38  ;;  %v196_v48 = vadd.f32 %v168_v43, %v140_v28  ;;  %v189_v51 = vmul.f32 0.6931472, %v296_v46 }
  0x5b   :  { %v186_v50 = vsel %vm185_vm4, %v183_v33, %v180_v39  ;;  %v197_v52 = vadd.f32 %v177_v47, %v141_v31 }
  0x5c   :  { %v198_v55 = vadd.f32 %v186_v50, %v142_v37  ;;  %v200_v56 = vmul.f32 %v196_v48, %v124_v19  ;;  %v195_v49 = vsel %vm194_vm5, %v192_v45, %v189_v51 }
  0x5d   :  { %v201_v57 = vmul.f32 %v197_v52, %v125_v22  ;;  %v199_v58 = vadd.f32 %v195_v49, %v143_v42 }
  0x5e   :  { %v202_v59 = vmul.f32 %v198_v55, %v126_v34  ;;  %v204_v60 = vsel %vm94_vm0, %v200_v56, 0.0 }
  0x5f   :  { %v205_v62 = vsel %vm95_vm1, %v201_v57, 0.0  ;;  %v203_v0 = vmul.f32 %v199_v58, %v127_v54 }
  0x60   :  { %v206_v1 = vsel %vm96_vm6, %v202_v59, 0.0  ;;  %v213_v2 = vadd.f32 %v205_v62, %v204_v60 }
  0x61   :  { %v207_v3 = vsel %vm97_vm7, %v203_v0, 0.0 }
  0x62   :  { %v214_v8 = vadd.f32 %v213_v2, %v206_v1 }
  0x64   :  { %v215_v10 = vadd.f32 %v214_v8, %v207_v3 }
  0x66   :  { %229 = vadd.xlane.f32.xlu0 %v215_v10 }
  0x6a   :  { %242 = vadd.xlane.f32.xlu0 %v221_v11 }
  0xf3   :  { %v230_v35 = vpop.xlane.xlu0 %229 }
  0xf4   :  { %v231_v12 = vrot.slane %v230_v35, 4 }
  0xf6   :  { %v232_v13 = vadd.f32 %v231_v12, %v230_v35 }
  0xf7   :  { %v243_v14 = vpop.xlane.xlu0 %242 }
  0xf8   :  { %v233_v41 = vrot.slane %v232_v13, 2  ;;  %v244_v15 = vrot.slane %v243_v14, 4 }
  0xfa   :  { %v245_v36 = vadd.f32 %v244_v15, %v243_v14  ;;  %v234_v16 = vadd.f32 %v233_v41, %v232_v13 }
  0xfc   :  { %v246_v17 = vrot.slane %v245_v36, 2  ;;  %v235_v18 = vrot.slane %v234_v16, 1 }
  0xfe   :  { %v247_v19 = vadd.f32 %v246_v17, %v245_v36  ;;  %v236_v20 = vadd.f32 %v235_v18, %v234_v16 }
 0x100   :  { %271 = vpush %v236_v20  ;;  %v248_v21 = vrot.slane %v247_v19, 1 }
 0x102   :  { %v249_v22 = vadd.f32 %v248_v21, %v247_v19 }
 0x104   :  { %273 = vpush %v249_v22 }
 0x131   :  { %s272_s2 = spop %271 }
 0x132   :  { %v238_v23 = vstv %s272_s2 }
 0x133   :  { %v239_v26 = vsel %vm227_vm8, %v238_v23, 0.0 }
 0x135   :  { %s274_s21 = spop %273 }
 0x136   :  { %v251_v24 = vstv %s274_s21 }
 0x137   :  { %v252_v27 = vsel %vm240_vm9, %v251_v24, 0.0 }
 0x138   :  { %v253_v28 = vadd.f32 %v252_v27, %v239_v26 }
 0x13a   :  { %254 = vst [vmem:[#allocation10] sm:$0xff] %v253_v28 }
 0x13b   :  { %374 = shalt.err (!%p371_p0)
}
 0x13c   :  { %s375_s27 = scalar_lea.hbm %s541_s3, 128 }
 0x13d   :  { %p376_p1 = scmp.ne.s32.totalorder %s541_s3, %s375_s27  ;;  %p379_p2 = scmp.lt.u32.totalorder %s375_s27, %s541_s3 }
 0x13f   :  { %p381_p3 = pnand %p379_p2, %p376_p1 }
 0x141   :  { %384 = shalt.err (!%p381_p3)
}
 0x142   :  { %264 = dma.vmem_to_hbm [thread:$0]  %s262_s23, 128, %s541_s3, [#allocation6]  }
 0x143   :  { %389 = dma.done.wait [#allocation6], 128  }
 0x144   :  { %390 = vsyncadd [#allocation6], 4294967168 }
 0x145   :  { %268 = vsyncpa [#allocation5], 1 }
 0x146   :  { %269 = vsyncpa [#allocation8], 1 }
 0x147   :  { %270 = vsyncpa [#allocation6], 1 }

</bundles_post_ra>
